<compile_context>
chip_gen: v7x
topology: tpu7x:2x2x1
jax: 0.10.0
libtpu: 0.0.40
codegen_flags: <defaults>
</compile_context>

<pallas_src>
import functools

import jax
import jax.numpy as jnp
import numpy as np
from jax.experimental import pallas as pl
from jax.experimental.pallas import tpu as pltpu


def _round_up(x, m):
    return (x + m - 1) // m * m


def _pick_tile(dim, candidates=(512, 256, 128)):
    for t in candidates:
        if dim % t == 0:
            return t
    return 128


def _grouped_gemm_kernel(tm, mtid_ref, widx_ref, rs_ref, re_ref,
                         a_ref, b_ref, out_ref, acc_ref):
    # grid = (n_tiles, work_items, k_tiles); w and k are reduction-like axes.
    w = pl.program_id(1)
    k = pl.program_id(2)
    nw = pl.num_programs(1)
    nk = pl.num_programs(2)

    mtid = mtid_ref[w]
    prev_mtid = mtid_ref[jnp.maximum(w - 1, 0)]
    next_mtid = mtid_ref[jnp.minimum(w + 1, nw - 1)]
    first_for_tile = jnp.logical_or(w == 0, mtid != prev_mtid)
    last_for_tile = jnp.logical_or(w == nw - 1, mtid != next_mtid)

    row_start = rs_ref[w]
    row_end = re_ref[w]
    tile_row0 = mtid * tm
    valid = row_start < row_end                       # padding items: rs == re
    interior = jnp.logical_and(row_start <= tile_row0,
                               row_end >= tile_row0 + tm)

    @pl.when(jnp.logical_and(first_for_tile, k == 0))
    def _():
        acc_ref[...] = jnp.zeros_like(acc_ref)

    # Fast path: whole token tile belongs to this group -> plain matmul.
    @pl.when(jnp.logical_and(valid, interior))
    def _():
        acc_ref[...] += jnp.dot(a_ref[...], b_ref[...],
                                preferred_element_type=jnp.float32)

    # Boundary tile: mask rows belonging to other groups (or padding rows).
    @pl.when(jnp.logical_and(valid, jnp.logical_not(interior)))
    def _():
        rows = tile_row0 + jax.lax.broadcasted_iota(jnp.int32, (tm, 1), 0)
        mask = jnp.logical_and(rows >= row_start, rows < row_end)
        a_tile = a_ref[...]
        a_masked = jnp.where(mask, a_tile, jnp.zeros_like(a_tile))
        acc_ref[...] += jnp.dot(a_masked, b_ref[...],
                                preferred_element_type=jnp.float32)

    @pl.when(jnp.logical_and(last_for_tile, k == nk - 1))
    def _():
        out_ref[...] = acc_ref[...].astype(out_ref.dtype)


@functools.partial(jax.jit, static_argnames=("batch_size", "tm", "c_dtype"))
def grouped_gemm_pallas(a, b, c, batch_size, seg_indptr, weight_indices,
                        *, tm=128, c_dtype=None):
    """For each group g: out[s_g:e_g] = a[s_g:e_g] @ b[widx[g]].T; else c."""
    # NOTE: tm=128 works well everywhere; use tm=256 on v6e/v7x for large M.
    M, K = a.shape
    E, N, Kb = b.shape
    assert Kb == K
    if c_dtype is None:
        c_dtype = c.dtype

    seg_indptr = seg_indptr.astype(jnp.int32)
    weight_indices = weight_indices.astype(jnp.int32)

    # ---- pad problem dims -------------------------------------------------
    Mp = _round_up(max(M, tm), tm)
    Kp = _round_up(K, 128)
    Np = _round_up(N, 128)
    tk = _pick_tile(Kp)
    tn = _pick_tile(Np)

    a_p = a
    if (Mp, Kp) != (M, K):
        a_p = jnp.pad(a, ((0, Mp - M), (0, Kp - K)))
    # One-time layout change [E, N, K] -> [E, K, N] so the kernel contracts K
    # on the sublane axis (no in-kernel XLU transpose).
    # TODO(synk): in a real deployment store expert weights as [E, K, N].
    bt = jnp.swapaxes(b, 1, 2)
    if (Kp, Np) != (K, N):
        bt = jnp.pad(bt, ((0, 0), (0, Kp - K), (0, Np - N)))

    num_m_tiles = Mp // tm
    num_n_tiles = Np // tn
    num_k_tiles = Kp // tk

    # ---- per-work-item metadata (megablox style) --------------------------
    s = seg_indptr[:-1]
    e = seg_indptr[1:]
    nonempty = e > s
    first_tile = s // tm
    last_tile = jnp.where(nonempty, (e - 1) // tm, first_tile)
    counts = jnp.where(nonempty, last_tile - first_tile + 1, 0).astype(jnp.int32)
    work_off = jnp.concatenate(
        [jnp.zeros((1,), jnp.int32), jnp.cumsum(counts, dtype=jnp.int32)])
    w_actual = work_off[-1]

    w_max = num_m_tiles + batch_size - 1          # static upper bound
    w_idx = jnp.arange(w_max, dtype=jnp.int32)
    gid = jnp.clip(
        jnp.searchsorted(work_off, w_idx, side="right").astype(jnp.int32) - 1,
        0, batch_size - 1)
    mtid_raw = jnp.take(first_tile, gid) + (w_idx - jnp.take(work_off, gid))
    widx_raw = jnp.take(weight_indices, gid)

    valid = w_idx < w_actual
    last_real = jnp.maximum(w_actual - 1, 0)
    pad_mtid = jnp.where(w_actual > 0, jnp.take(mtid_raw, last_real), 0)
    pad_widx = jnp.where(w_actual > 0, jnp.take(widx_raw, last_real), 0)

    mtid = jnp.clip(jnp.where(valid, mtid_raw, pad_mtid),
                    0, num_m_tiles - 1).astype(jnp.int32)
    work_widx = jnp.clip(jnp.where(valid, widx_raw, pad_widx),
                         0, E - 1).astype(jnp.int32)
    row_start = jnp.where(valid, jnp.take(s, gid), 0).astype(jnp.int32)
    row_end = jnp.where(valid, jnp.take(e, gid), 0).astype(jnp.int32)

    grid = (num_n_tiles, w_max, num_k_tiles)
    kernel = functools.partial(_grouped_gemm_kernel, tm)

    grid_spec = pltpu.PrefetchScalarGridSpec(
        num_scalar_prefetch=4,   # mtid, work_widx, row_start, row_end -> SMEM
        grid=grid,
        in_specs=[
            # a: token tile picked by this work item's m-tile id, K tiled.
            pl.BlockSpec((tm, tk),
                         lambda n, w, k, mtid, widx, rs, re: (mtid[w], k)),
            # b: expert weight tile picked by this work item's weight index.
            pl.BlockSpec((None, tk, tn),
                         lambda n, w, k, mtid, widx, rs, re: (widx[w], k, n)),
        ],
        out_specs=pl.BlockSpec(
            (tm, tn), lambda n, w, k, mtid, widx, rs, re: (mtid[w], n)),
        scratch_shapes=[pltpu.VMEM((tm, tn), jnp.float32)],
    )

    y = pl.pallas_call(
        kernel,
        out_shape=jax.ShapeDtypeStruct((Mp, Np), c_dtype),
        grid_spec=grid_spec,
        compiler_params=pltpu.CompilerParams(
            dimension_semantics=("parallel", "arbitrary", "arbitrary")),
    )(mtid, work_widx, row_start, row_end, a_p, bt)

    # Rows outside all segments keep their original c contents (handled here
    # so the hot loop never reads c).
    rows = jnp.arange(M, dtype=jnp.int32)
    in_seg = jnp.logical_and(rows >= seg_indptr[0], rows < seg_indptr[-1])
    return jnp.where(in_seg[:, None], y[:M, :N].astype(c_dtype),
                     c.astype(c_dtype))


class GroupedGemmRunner:
    """JAX/Pallas port of sglang GroupedGemmRunner (non-flashinfer path)."""

    def __init__(self, device=None, use_flashinfer: bool = False,
                 use_per_token_if_dynamic: bool = True):
        assert not use_flashinfer, "flashinfer path not supported on TPU"
        self.use_per_token_if_dynamic = use_per_token_if_dynamic
        # TODO(synk): fp8 w8a8 / block-quant scales (use_fp8_w8a8, scale_a/b,
        # block_shape) are not implemented; only the bf16/f32 path is ported.

    def forward(self, a, b, c, batch_size, weight_column_major,
                seg_indptr=None, weight_indices=None, use_fp8_w8a8=False,
                scale_a=None, scale_b=None, block_shape=None, c_dtype=None):
        assert weight_column_major is True
        assert not use_fp8_w8a8 and block_shape is None
        if weight_indices is None:
            weight_indices = jnp.arange(batch_size, dtype=jnp.int32)
        if c_dtype is None:
            c_dtype = c.dtype
        return grouped_gemm_pallas(a, b, c, batch_size, seg_indptr,
                                   weight_indices, c_dtype=c_dtype)


def _reference(a, b, c, batch_size, seg_indptr, weight_indices):
    a_np = np.asarray(a, dtype=np.float32)
    b_np = np.asarray(b, dtype=np.float32)
    ref = np.asarray(c, dtype=np.float32).copy()
    seg_np = np.asarray(seg_indptr)
    widx_np = np.asarray(weight_indices)
    for g in range(batch_size):
        lo, hi = int(seg_np[g]), int(seg_np[g + 1])
        if hi > lo:
            ref[lo:hi] = a_np[lo:hi] @ b_np[widx_np[g]].T
    return ref


if __name__ == "__main__":
    runner = GroupedGemmRunner(device=None, use_flashinfer=False)

    # ---- test 1: small MoE-like problem -----------------------------------
    key = jax.random.PRNGKey(0)
    k_a, k_b, k_a2, k_b2, k_c2 = jax.random.split(key, 5)

    M, K, N, E, batch_size = 24, 128, 128, 6, 4
    seg_indptr = jnp.array([0, 5, 5, 14, 24], dtype=jnp.int32)
    weight_indices = jnp.array([1, 3, 0, 5], dtype=jnp.int32)
    a = jax.random.normal(k_a, (M, K), dtype=jnp.float32).astype(jnp.bfloat16)
    b = jax.random.normal(k_b, (E, N, K), dtype=jnp.float32).astype(jnp.bfloat16)
    c = jnp.zeros((M, N), dtype=jnp.bfloat16)

    out = runner.forward(a, b, c, batch_size, weight_column_major=True,
                         seg_indptr=seg_indptr, weight_indices=weight_indices,
                         c_dtype=jnp.bfloat16)
    out = jax.block_until_ready(out)
    ref = _reference(a, b, c, batch_size, seg_indptr, weight_indices)
    np.testing.assert_allclose(np.asarray(out, dtype=np.float32), ref,
                               rtol=2e-2, atol=2e-1)

    # ---- test 2: multi-tile groups, empty group, c pass-through -----------
    M2, K2, N2, E2, batch2 = 300, 384, 384, 4, 3
    seg2 = jnp.array([0, 130, 130, 260], dtype=jnp.int32)
    widx2 = jnp.array([2, 0, 3], dtype=jnp.int32)
    a2 = jax.random.normal(k_a2, (M2, K2), dtype=jnp.float32).astype(jnp.bfloat16)
    b2 = jax.random.normal(k_b2, (E2, N2, K2), dtype=jnp.float32).astype(jnp.bfloat16)
    c2 = jax.random.normal(k_c2, (M2, N2), dtype=jnp.float32).astype(jnp.bfloat16)

    out2 = runner.forward(a2, b2, c2, batch2, weight_column_major=True,
                          seg_indptr=seg2, weight_indices=widx2,
                          c_dtype=jnp.bfloat16)
    out2 = jax.block_until_ready(out2)
    ref2 = _reference(a2, b2, c2, batch2, seg2, widx2)
    np.testing.assert_allclose(np.asarray(out2, dtype=np.float32), ref2,
                               rtol=2e-2, atol=3e-1)

    print("KERNEL_OK")
</pallas_src>

<mosaic_0001>
module attributes {stable_mosaic.version = 11 : i64} {
  func.func @_grouped_gemm_kernel(%arg0: i32, %arg1: i32, %arg2: i32, %arg3: memref<4xi32, #tpu.memory_space<smem>>, %arg4: memref<4xi32, #tpu.memory_space<smem>>, %arg5: memref<4xi32, #tpu.memory_space<smem>>, %arg6: memref<4xi32, #tpu.memory_space<smem>>, %arg7: memref<128x128xbf16, #tpu.memory_space<vmem>>, %arg8: memref<1x128x128xbf16, #tpu.memory_space<vmem>>, %arg9: memref<128x128xbf16, #tpu.memory_space<vmem>>, %arg10: memref<128x128xf32, #tpu.memory_space<vmem>>) attributes {dimension_semantics = [#tpu.dimension_semantics<parallel>, #tpu.dimension_semantics<arbitrary>, #tpu.dimension_semantics<arbitrary>], iteration_bounds = array<i64: 1, 4, 1>, scalar_prefetch = 4 : i64, scratch_operands = 1 : i64, tpu.core_type = #tpu.core_type<tc>, window_params = [{transform_indices = @transform_0, window_bounds = array<i64: 128, 128>}, {transform_indices = @transform_1, window_bounds = array<i64: 1, 128, 128>}, {transform_indices = @transform_2, window_bounds = array<i64: 128, 128>}]} {
    %0 = arith.index_cast %arg1 : i32 to index
    %1 = memref.load %arg3[%0] : memref<4xi32, #tpu.memory_space<smem>>
    %c1_i32 = arith.constant 1 : i32
    %2 = arith.subi %arg1, %c1_i32 : i32
    %c0_i32 = arith.constant 0 : i32
    %3 = arith.maxsi %2, %c0_i32 : i32
    %4 = arith.index_cast %3 : i32 to index
    %5 = memref.load %arg3[%4] : memref<4xi32, #tpu.memory_space<smem>>
    %c1_i32_0 = arith.constant 1 : i32
    %6 = arith.addi %arg1, %c1_i32_0 : i32
    %c3_i32 = arith.constant 3 : i32
    %7 = arith.minsi %6, %c3_i32 : i32
    %8 = arith.index_cast %7 : i32 to index
    %9 = memref.load %arg3[%8] : memref<4xi32, #tpu.memory_space<smem>>
    %c0_i32_1 = arith.constant 0 : i32
    %10 = arith.cmpi eq, %arg1, %c0_i32_1 : i32
    %11 = arith.cmpi ne, %1, %5 : i32
    %12 = arith.ori %10, %11 : i1
    %c3_i32_2 = arith.constant 3 : i32
    %13 = arith.cmpi eq, %arg1, %c3_i32_2 : i32
    %14 = arith.cmpi ne, %1, %9 : i32
    %15 = arith.ori %13, %14 : i1
    %16 = arith.index_cast %arg1 : i32 to index
    %17 = memref.load %arg5[%16] : memref<4xi32, #tpu.memory_space<smem>>
    %18 = arith.index_cast %arg1 : i32 to index
    %19 = memref.load %arg6[%18] : memref<4xi32, #tpu.memory_space<smem>>
    %c128_i32 = arith.constant 128 : i32
    %20 = arith.muli %1, %c128_i32 : i32
    %21 = arith.cmpi slt, %17, %19 : i32
    %22 = arith.cmpi sle, %17, %20 : i32
    %c128_i32_3 = arith.constant 128 : i32
    %23 = arith.addi %20, %c128_i32_3 : i32
    %24 = arith.cmpi sge, %19, %23 : i32
    %25 = arith.andi %22, %24 : i1
    %c0_i32_4 = arith.constant 0 : i32
    %26 = arith.cmpi eq, %arg2, %c0_i32_4 : i32
    %27 = arith.andi %12, %26 : i1
    %28 = arith.extui %27 : i1 to i32
    %c0_i32_5 = arith.constant 0 : i32
    %29 = arith.cmpi ne, %28, %c0_i32_5 : i32
    scf.if %29 {
      %cst = arith.constant 0.000000e+00 : f32
      %41 = vector.broadcast %cst : f32 to vector<128x128xf32>
      %c0 = arith.constant 0 : index
      %c0_10 = arith.constant 0 : index
      %42 = vector.load %arg10[%c0, %c0_10] : memref<128x128xf32, #tpu.memory_space<vmem>>, vector<128x128xf32>
      tpu.vector_store %arg10[%c0, %c0_10], %41 {strides = array<i32>} : memref<128x128xf32, #tpu.memory_space<vmem>>, vector<128x128xf32>,
    } else {
    }
    %30 = arith.andi %21, %25 : i1
    %31 = arith.extui %30 : i1 to i32
    %c0_i32_6 = arith.constant 0 : i32
    %32 = arith.cmpi ne, %31, %c0_i32_6 : i32
    scf.if %32 {
      %c0 = arith.constant 0 : index
      %c0_10 = arith.constant 0 : index
      %41 = vector.load %arg10[%c0, %c0_10] : memref<128x128xf32, #tpu.memory_space<vmem>>, vector<128x128xf32>
      %c0_11 = arith.constant 0 : index
      %c0_12 = arith.constant 0 : index
      %42 = vector.load %arg7[%c0_11, %c0_12] : memref<128x128xbf16, #tpu.memory_space<vmem>>, vector<128x128xbf16>
      %c0_13 = arith.constant 0 : index
      %c0_14 = arith.constant 0 : index
      %c0_15 = arith.constant 0 : index
      %43 = vector.load %arg8[%c0_13, %c0_14, %c0_15] : memref<1x128x128xbf16, #tpu.memory_space<vmem>>, vector<1x128x128xbf16>
      %44 = vector.shape_cast %43 : vector<1x128x128xbf16> to vector<128x128xbf16>
      %cst = arith.constant dense<0.000000e+00> : vector<128x128xf32>
      %45 = tpu.matmul %42, %44, %cst {dimension_numbers = #tpu.dot_dimension_numbers<[1], [0], [0], [1], [0, 0, 1, 1], [], []>} : vector<128x128xbf16>, vector<128x128xbf16>, vector<128x128xf32> -> vector<128x128xf32>
      %46 = arith.addf %41, %45 : vector<128x128xf32>
      %c0_16 = arith.constant 0 : index
      %c0_17 = arith.constant 0 : index
      %47 = vector.load %arg10[%c0_16, %c0_17] : memref<128x128xf32, #tpu.memory_space<vmem>>, vector<128x128xf32>
      tpu.vector_store %arg10[%c0_16, %c0_17], %46 {strides = array<i32>} : memref<128x128xf32, #tpu.memory_space<vmem>>, vector<128x128xf32>,
    } else {
    }
    %true = arith.constant true
    %33 = arith.xori %25, %true : i1
    %34 = arith.andi %21, %33 : i1
    %35 = arith.extui %34 : i1 to i32
    %c0_i32_7 = arith.constant 0 : i32
    %36 = arith.cmpi ne, %35, %c0_i32_7 : i32
    scf.if %36 {
      %41 = tpu.iota {dimensions = array<i32: 0>} : vector<128x1xi32>
      %42 = vector.broadcast %20 : i32 to vector<128x1xi32>
      %43 = arith.addi %42, %41 : vector<128x1xi32>
      %44 = vector.broadcast %17 : i32 to vector<128x1xi32>
      %45 = arith.cmpi sge, %43, %44 : vector<128x1xi32>
      %46 = vector.broadcast %19 : i32 to vector<128x1xi32>
      %47 = arith.cmpi slt, %43, %46 : vector<128x1xi32>
      %48 = arith.andi %45, %47 : vector<128x1xi1>
      %c0 = arith.constant 0 : index
      %c0_10 = arith.constant 0 : index
      %49 = vector.load %arg7[%c0, %c0_10] : memref<128x128xbf16, #tpu.memory_space<vmem>>, vector<128x128xbf16>
      %cst = arith.constant 0.000000e+00 : bf16
      %50 = vector.broadcast %cst : bf16 to vector<128x128xbf16>
      %51 = vector.shape_cast %48 : vector<128x1xi1> to vector<128x1xi1>
      %52 = vector.broadcast %51 : vector<128x1xi1> to vector<128x128xi1>
      %53 = arith.select %52, %49, %50 : vector<128x128xi1>, vector<128x128xbf16>
      %c0_11 = arith.constant 0 : index
      %c0_12 = arith.constant 0 : index
      %54 = vector.load %arg10[%c0_11, %c0_12] : memref<128x128xf32, #tpu.memory_space<vmem>>, vector<128x128xf32>
      %c0_13 = arith.constant 0 : index
      %c0_14 = arith.constant 0 : index
      %c0_15 = arith.constant 0 : index
      %55 = vector.load %arg8[%c0_13, %c0_14, %c0_15] : memref<1x128x128xbf16, #tpu.memory_space<vmem>>, vector<1x128x128xbf16>
      %56 = vector.shape_cast %55 : vector<1x128x128xbf16> to vector<128x128xbf16>
      %cst_16 = arith.constant dense<0.000000e+00> : vector<128x128xf32>
      %57 = tpu.matmul %53, %56, %cst_16 {dimension_numbers = #tpu.dot_dimension_numbers<[1], [0], [0], [1], [0, 0, 1, 1], [], []>} : vector<128x128xbf16>, vector<128x128xbf16>, vector<128x128xf32> -> vector<128x128xf32>
      %58 = arith.addf %54, %57 : vector<128x128xf32>
      %c0_17 = arith.constant 0 : index
      %c0_18 = arith.constant 0 : index
      %59 = vector.load %arg10[%c0_17, %c0_18] : memref<128x128xf32, #tpu.memory_space<vmem>>, vector<128x128xf32>
      tpu.vector_store %arg10[%c0_17, %c0_18], %58 {strides = array<i32>} : memref<128x128xf32, #tpu.memory_space<vmem>>, vector<128x128xf32>,
    } else {
    }
    %c0_i32_8 = arith.constant 0 : i32
    %37 = arith.cmpi eq, %arg2, %c0_i32_8 : i32
    %38 = arith.andi %15, %37 : i1
    %39 = arith.extui %38 : i1 to i32
    %c0_i32_9 = arith.constant 0 : i32
    %40 = arith.cmpi ne, %39, %c0_i32_9 : i32
    scf.if %40 {
      %c0 = arith.constant 0 : index
      %c0_10 = arith.constant 0 : index
      %41 = vector.load %arg10[%c0, %c0_10] : memref<128x128xf32, #tpu.memory_space<vmem>>, vector<128x128xf32>
      %42 = arith.truncf %41 : vector<128x128xf32> to vector<128x128xbf16>
      %c0_11 = arith.constant 0 : index
      %c0_12 = arith.constant 0 : index
      %43 = vector.load %arg9[%c0_11, %c0_12] : memref<128x128xbf16, #tpu.memory_space<vmem>>, vector<128x128xbf16>
      tpu.vector_store %arg9[%c0_11, %c0_12], %42 {strides = array<i32>} : memref<128x128xbf16, #tpu.memory_space<vmem>>, vector<128x128xbf16>,
    } else {
    }
    return
  }
  func.func @transform_0(%arg0: i32, %arg1: i32, %arg2: i32, %arg3: memref<4xi32, #tpu.memory_space<smem>>, %arg4: memref<4xi32, #tpu.memory_space<smem>>, %arg5: memref<4xi32, #tpu.memory_space<smem>>, %arg6: memref<4xi32, #tpu.memory_space<smem>>) -> (i32, i32) {
    %0 = arith.index_cast %arg1 : i32 to index
    %1 = memref.load %arg3[%0] : memref<4xi32, #tpu.memory_space<smem>>
    %c0_i32 = arith.constant 0 : i32
    return %1, %arg2 : i32, i32
  }
  func.func @transform_1(%arg0: i32, %arg1: i32, %arg2: i32, %arg3: memref<4xi32, #tpu.memory_space<smem>>, %arg4: memref<4xi32, #tpu.memory_space<smem>>, %arg5: memref<4xi32, #tpu.memory_space<smem>>, %arg6: memref<4xi32, #tpu.memory_space<smem>>) -> (i32, i32, i32) {
    %0 = arith.index_cast %arg1 : i32 to index
    %1 = memref.load %arg4[%0] : memref<4xi32, #tpu.memory_space<smem>>
    %c0_i32 = arith.constant 0 : i32
    return %1, %arg2, %arg0 : i32, i32, i32
  }
  func.func @transform_2(%arg0: i32, %arg1: i32, %arg2: i32, %arg3: memref<4xi32, #tpu.memory_space<smem>>, %arg4: memref<4xi32, #tpu.memory_space<smem>>, %arg5: memref<4xi32, #tpu.memory_space<smem>>, %arg6: memref<4xi32, #tpu.memory_space<smem>>) -> (i32, i32) {
    %0 = arith.index_cast %arg1 : i32 to index
    %1 = memref.load %arg3[%0] : memref<4xi32, #tpu.memory_space<smem>>
    %c0_i32 = arith.constant 0 : i32
    return %1, %arg0 : i32, i32
  }
}

</mosaic_0001>

<bundles_post_ra>
// kernel: custom-call
= control target key start
LH: loop header
LB: loop body
LE: loop exit
PB: predicated region body
PF: predicated region fallthrough
CT: control target
= control target key end

     0   :  { %s6_s0 = inlined_call_operand.vmem [shape: u32[4], index: 0, kind: output, shape index: {}]  }

// kernel: grouped_gemm_pallas.1
= control target key start
LH: loop header
LB: loop body
LE: loop exit
PB: predicated region body
PF: predicated region fallthrough
CT: control target
= control target key end

     0   :  { %s2033_s0 = inlined_call_operand.vmem [shape: s32[4], index: 0, kind: input, shape index: {}]   ;;  %s2034_s4 = inlined_call_operand.vmem [shape: bf16[128,128], index: 4, kind: input, shape index: {}]   ;;  %s2035_s5 = inlined_call_operand.vmem [shape: bf16[6,128,128], index: 5, kind: input, shape index: {}]   ;;  %s2036_s6 = inlined_call_operand.vmem [shape: bf16[128,128], index: 6, kind: output, shape index: {}]   ;;  %s2037_s1 = inlined_call_operand.vmem [shape: s32[4], index: 1, kind: input, shape index: {}]   ;;  %s2038_s2 = inlined_call_operand.vmem [shape: s32[4], index: 2, kind: input, shape index: {}]   ;;  %s2039_s3 = inlined_call_operand.vmem [shape: s32[4], index: 3, kind: input, shape index: {}]  }
   0x1   :  { %s11_s23 = sshll.u32 %s2033_s0, 4  ;;  %s15_s26 = sshll.u32 %s2037_s1, 4  ;;  %s12_s23 = int_to_ptr.vmem [resolvable:$true] %s11_s23  ;;  %s16_s26 = int_to_ptr.vmem [resolvable:$true] %s15_s26 }
   0x2   :  { %s1537_s27 = scalar_lea.vmem %s12_s23, 16  ;;  %p1542_p1 = scmp.lt.s32.totalorder %s12_s23, %s12_s23 }
   0x3   :  { %p1538_p0 = scmp.ne.s32.totalorder %s12_s23, %s1537_s27  ;;  %p1543_p2 = scmp.lt.s32.totalorder %s1537_s27, %s1537_s27 }
   0x5   :  { %p1544_p3 = por %p1543_p2, %p1542_p1 }
   0x7   :  { %p1545_p4 = pnand %p1544_p3, %p1538_p0 }
   0x9   :  { %1548 = shalt.err (!%p1545_p4)  }
   0xa   :  { %s1611_s28 = smov [#allocation4]   ;;  %s1549_s29 = scalar_lea.vmem %s16_s26, 16 }
   0xb   :  { %14 = dma.vmem_to_smem %s12_s23, 16, %s1611_s28, [#allocation3] }
   0xc   :  { %p1550_p5 = scmp.ne.s32.totalorder %s16_s26, %s1549_s29  ;;  %p1554_p6 = scmp.lt.s32.totalorder %s16_s26, %s16_s26 }
   0xd   :  { %p1555_p7 = scmp.lt.s32.totalorder %s1549_s29, %s1549_s29 }
   0xf   :  { %p1556_p8 = por %p1555_p7, %p1554_p6 }
  0x11   :  { %p1557_p9 = pnand %p1556_p8, %p1550_p5 }
  0x13   :  { %1560 = shalt.err (!%p1557_p9)  }
  0x14   :  { %s1612_s0 = smov [#allocation5]   ;;  %s19_s7 = sshll.u32 %s2038_s2, 4  ;;  %s20_s7 = int_to_ptr.vmem [resolvable:$true] %s19_s7 }
  0x15   :  { %18 = dma.vmem_to_smem %s16_s26, 16, %s1612_s0, [#allocation3] }
  0x16   :  { %s23_s10 = sshll.u32 %s2039_s3, 4  ;;  %s1561_s11 = scalar_lea.vmem %s20_s7, 16  ;;  %s24_s10 = int_to_ptr.vmem [resolvable:$true] %s23_s10 }
  0x17   :  { %p1562_p10 = scmp.ne.s32.totalorder %s20_s7, %s1561_s11  ;;  %p1566_p11 = scmp.lt.s32.totalorder %s20_s7, %s20_s7 }
  0x18   :  { %p1567_p12 = scmp.lt.s32.totalorder %s1561_s11, %s1561_s11 }
  0x1a   :  { %p1568_p13 = por %p1567_p12, %p1566_p11 }
  0x1c   :  { %p1569_p0 = pnand %p1568_p13, %p1562_p10 }
  0x1e   :  { %1572 = shalt.err (!%p1569_p0)  }
  0x1f   :  { %s1613_s12 = smov [#allocation6]   ;;  %s1573_s13 = scalar_lea.vmem %s24_s10, 16 }
  0x20   :  { %22 = dma.vmem_to_smem %s20_s7, 16, %s1613_s12, [#allocation3] }
  0x21   :  { %p1574_p1 = scmp.ne.s32.totalorder %s24_s10, %s1573_s13  ;;  %p1578_p2 = scmp.lt.s32.totalorder %s24_s10, %s24_s10 }
  0x22   :  { %p1579_p3 = scmp.lt.s32.totalorder %s1573_s13, %s1573_s13 }
  0x24   :  { %p1580_p4 = por %p1579_p3, %p1578_p2 }
  0x26   :  { %p1581_p5 = pnand %p1580_p4, %p1574_p1 }
  0x28   :  { %1584 = shalt.err (!%p1581_p5)  }
  0x29   :  { %s1614_s2 = smov [#allocation7]  }
  0x2a   :  { %26 = dma.vmem_to_smem %s24_s10, 16, %s1614_s2, [#allocation3] }
  0x2b   :  { %1597 = dma.done.wait [#allocation3], 64 }
  0x2c   :  { %1598 = vsyncadd [#allocation3], 4294967232 }
  0x2d   :  { %28 = sfence }
  0x2e   :  { %s1663_s3 = smov 0   ;;  %s1665_s14 = smov 0  }
  0x2f   :  { %s1667_s15 = smov 0  }
  0x30 LB: > { %s49_s16 = sadd.s32 1, %s1605_s14  ;;  %p1231_p6 = scmp.ge.s32.totalorder %s1609_s15, 1  ;;  %s1609_s15 = sphi %s1667_s15, %s34_s15   ;;  %s1605_s14 = sphi %s1665_s14, %s2070_s14   ;;  %s1601_s3 = sphi %s1663_s3, %s2069_s3  }
  0x31   : > { %p51_p7 = scmp.ge.s32.totalorder %s49_s16, 4  ;;  %p193_p8 = scmp.lt.s32.totalorder %s1609_s15, 5 }
  0x33   : > { %s2072_s16 = smov (%p51_p7, %s49_s16), 0  ;;  %p194_p9 = pnand %p1231_p6, %p193_p8 }
  0x34   : > { %s236_s17 = sld [smem:[#allocation4 + %s1601_s3]] (!%p194_p9)  ;;  %s1238_s20 = sadd.s32 (!%p194_p9), 4294967295, %s1601_s3 }
  0x35   : > { %197 = sbr.rel (%p194_p9) target bundleno = 613 (0x265), region = 28  ;;  %s247_s18 = sld [smem:[#allocation5 + %s1601_s3]] (!%p194_p9) }
  0x36   : > { %s262_s19 = sld [smem:[#allocation4 + %s1601_s3]] (!%p194_p9)  ;;  %s279_s21 = sadd.s32 (!%p194_p9), 1, %s1601_s3 }
  0x37   : > { %s1689_s22 = sld [smem:[#allocation4 + %s1601_s3]] (!%p194_p9)  ;;  %p276_p10 = scmp.gt.s32.totalorder (!%p194_p9), %s1238_s20, 0 }
  0x38   : > { %p1691_p11 = scmp.lt.s32.totalorder (!%p194_p9), %s279_s21, 3  ;;  %p283_p12 = scmp.eq.s32.totalorder (!%p194_p9), %s1601_s3, 0 }
  0x39   : > { %s1709_s10 = sld [smem:[#allocation6 + %s1601_s3]] (!%p194_p9)  ;;  %p286_p3 = scmp.eq.s32.totalorder (!%p194_p9), %s1601_s3, 3 }
  0x3a   : > { %s1232_s24 = sshll.u32 (!%p194_p9), %s236_s17, 4  ;;  %s1717_s17 = sld [smem:[#allocation7 + %s1601_s3]] (!%p194_p9) }
  0x3b   : > { %p249_p13 = scmp.lt.s32.totalorder (!%p194_p9), %s247_s18, 5  ;;  %p238_p0 = scmp.lt.s32.totalorder (!%p194_p9), %s1232_s24, 15 }
  0x3c   : > { %s2074_s20 = smov (!%p276_p10, %s1238_s20), 0  ;;  %s1236_s25 = sshll.u32 %s262_s19, 4 }
  0x3d   : > { %s2076_s18 = smov (!%p249_p13, %s247_s18), 5  ;;  %s2078_s24 = smov (!%p238_p0, %s1232_s24), 15 }
  0x3e   : > { %s1292_s26 = sshll.u32 %s2076_s18, 6  ;;  %p264_p1 = scmp.lt.s32.totalorder %s1236_s25, 15 }
  0x3f   : > { %s1233_s27 = sshll.u32 %s2078_s24, 2  ;;  %s1699_s0 = scalar_lea.vmem %s2035_s5, %s1292_s26 }
  0x40   : > { %s1704_s7 = scalar_lea.vmem %s2034_s4, %s1233_s27  ;;  %s278_s8 = sld [smem:[#allocation4 + %s2074_s20]] }
  0x41   : > { %s2080_s25 = smov (!%p264_p1, %s1236_s25), 15  ;;  %s2082_s21 = smov (!%p1691_p11, %s279_s21), 3 }
  0x42   : > { %s1237_s9 = sshll.u32 %s2080_s25, 2  ;;  %s282_s2 = sld [smem:[#allocation4 + %s2082_s21]] }
  0x43   : > { %s1714_s13 = scalar_lea.vmem %s2036_s6, %s1237_s9  ;;  %s1720_s18 = sshll.u32 %s1689_s22, 7 }
  0x44   : > { %s294_s19 = sadd.s32 128, %s1720_s18  ;;  %p293_p5 = scmp.le.s32.totalorder %s1709_s10, %s1720_s18 }
  0x45   : > { %p292_p7 = scmp.lt.s32.totalorder %s1709_s10, %s1717_s17  ;;  %p295_p8 = scmp.ge.s32.totalorder %s1717_s17, %s294_s19 }
  0x46   : > { %p284_p2 = scmp.ne.s32.totalorder %s1689_s22, %s278_s8 }
  0x47   : > { %p1737_p10 = pnand %p295_p8, %p293_p5 }
  0x48   : > { %p285_p4 = por %p284_p2, %p283_p12  ;;  %p287_p6 = scmp.ne.s32.totalorder %s1689_s22, %s282_s2 }
  0x49   : > { %p297_p11 = pneg %p1737_p10  ;;  %v1615_v0 = vmov (%p285_p4), 0.0  }
  0x4a   : > { %p1733_p9 = por %p287_p6, %p286_p3  ;;  %302 = sbr.rel (!%p285_p4) target bundleno = 82 (0x52), region = 32  ;;  %303 = vst [vmem:[#allocation2] sm:$0xff] (%p285_p4), %v1615_v0  ;;  %304 = vst [vmem:[#allocation2 + $0x8] sm:$0xff] (%p285_p4), %v1615_v0 }
  0x4b   : > { %305 = vst [vmem:[#allocation2 + $0x10] sm:$0xff] (%p285_p4), %v1615_v0  ;;  %306 = vst [vmem:[#allocation2 + $0x18] sm:$0xff] (%p285_p4), %v1615_v0 }
  0x4c   : > { %307 = vst [vmem:[#allocation2 + $0x20] sm:$0xff] (%p285_p4), %v1615_v0  ;;  %308 = vst [vmem:[#allocation2 + $0x28] sm:$0xff] (%p285_p4), %v1615_v0 }
  0x4d   : > { %309 = vst [vmem:[#allocation2 + $0x30] sm:$0xff] (%p285_p4), %v1615_v0  ;;  %310 = vst [vmem:[#allocation2 + $0x38] sm:$0xff] (%p285_p4), %v1615_v0 }
  0x4e   : > { %311 = vst [vmem:[#allocation2 + $0x40] sm:$0xff] (%p285_p4), %v1615_v0  ;;  %312 = vst [vmem:[#allocation2 + $0x48] sm:$0xff] (%p285_p4), %v1615_v0 }
  0x4f   : > { %313 = vst [vmem:[#allocation2 + $0x50] sm:$0xff] (%p285_p4), %v1615_v0  ;;  %314 = vst [vmem:[#allocation2 + $0x58] sm:$0xff] (%p285_p4), %v1615_v0 }
  0x50   : > { %315 = vst [vmem:[#allocation2 + $0x60] sm:$0xff] (%p285_p4), %v1615_v0  ;;  %316 = vst [vmem:[#allocation2 + $0x68] sm:$0xff] (%p285_p4), %v1615_v0 }
  0x51   : > { %317 = vst [vmem:[#allocation2 + $0x70] sm:$0xff] %v1615_v0  ;;  %318 = vst [vmem:[#allocation2 + $0x78] sm:$0xff] %v1615_v0 }
  0x52 PF: > { %p319_p12 = pnand %p297_p11, %p292_p7 }
  0x53   : > { %v1513_v1 = vld [vmem:[%s1699_s0] sm:$0xff] (!%p319_p12)   ;;  %v1514_v2 = vld [vmem:[%s1699_s0 + $0x8] sm:$0xff] (!%p319_p12)   ;;  %v1515_v3 = vld [vmem:[%s1699_s0 + $0x10] sm:$0xff] (!%p319_p12)  }
  0x54   : > { %322 = sbr.rel (%p319_p12) target bundleno = 342 (0x156), region = 36  ;;  %1388 = vmatprep.subr.bf16.mxu0 (!%p319_p12), %v1513_v1  ;;  %1452 = vmatprep.subr.bf16.mxu1 (!%p319_p12), %v1513_v1  ;;  %v1516_v4 = vld [vmem:[%s1699_s0 + $0x18] sm:$0xff] (!%p319_p12)   ;;  %v1521_v5 = vld [vmem:[%s1704_s7] sm:$0xff] (!%p319_p12)   ;;  %v1518_v8 = vld [vmem:[%s1699_s0 + $0x28] sm:$0xff] (!%p319_p12)  }
  0x55   : > { %1389 = vmatpush3.bf16.msra.mxu0 (!%p319_p12), %v1513_v1  ;;  %1460 = vmatpush3.bf16.msra.mxu1 (!%p319_p12), %v1513_v1  ;;  %v1522_v6 = vld [vmem:[%s1704_s7 + $0x20] sm:$0xff] (!%p319_p12)   ;;  %v1519_v9 = vld [vmem:[%s1699_s0 + $0x30] sm:$0xff] (!%p319_p12)   ;;  %v1520_v10 = vld [vmem:[%s1699_s0 + $0x38] sm:$0xff] (!%p319_p12)  }
  0x56   : > { %1390 = vmatprep.subr.bf16.mxu0 (!%p319_p12), %v1514_v2  ;;  %1453 = vmatprep.subr.bf16.mxu1 (!%p319_p12), %v1514_v2  ;;  %v1517_v7 = vld [vmem:[%s1699_s0 + $0x20] sm:$0xff] (!%p319_p12)   ;;  %v1523_v11 = vld [vmem:[%s1704_s7 + $0x8] sm:$0xff] (!%p319_p12)   ;;  %v1525_v13 = vld [vmem:[%s1704_s7 + $0x10] sm:$0xff] (!%p319_p12)  }
  0x57   : > { %1404 = vmatprep.mubr.bf16.mxu0 (!%p319_p12), %v1521_v5  ;;  %1412 = vmatprep.mubr.bf16.mxu1 (!%p319_p12), %v1522_v6  ;;  %v1524_v12 = vld [vmem:[%s1704_s7 + $0x28] sm:$0xff] (!%p319_p12)   ;;  %v1526_v14 = vld [vmem:[%s1704_s7 + $0x30] sm:$0xff] (!%p319_p12)   ;;  %v1527_v15 = vld [vmem:[%s1704_s7 + $0x18] sm:$0xff] (!%p319_p12)  }
  0x58   : > { %v1528_v16 = vld [vmem:[%s1704_s7 + $0x38] sm:$0xff] (!%p319_p12)   ;;  %v325_v17 = vld [vmem:[#allocation2 + $0x10] sm:$0xff] (!%p319_p12)  ;;  %v323_v19 = vld [vmem:[#allocation2] sm:$0xff] (!%p319_p12) }
  0x59   : > { %1391 = vmatpush3.bf16.msra.mxu0 (!%p319_p12), %v1514_v2  ;;  %1461 = vmatpush3.bf16.msra.mxu1 (!%p319_p12), %v1514_v2  ;;  %v333_v18 = vld [vmem:[#allocation2 + $0x50] sm:$0xff] (!%p319_p12)  ;;  %v331_v20 = vld [vmem:[#allocation2 + $0x40] sm:$0xff] (!%p319_p12)  ;;  %v326_v23 = vld [vmem:[#allocation2 + $0x18] sm:$0xff] (!%p319_p12) }
  0x5a   : > { %1392 = vmatprep.subr.bf16.mxu0 (!%p319_p12), %v1515_v3  ;;  %1454 = vmatprep.subr.bf16.mxu1 (!%p319_p12), %v1515_v3  ;;  %v334_v24 = vld [vmem:[#allocation2 + $0x58] sm:$0xff] (!%p319_p12)  ;;  %v324_v29 = vld [vmem:[#allocation2 + $0x8] sm:$0xff] (!%p319_p12)  ;;  %v329_v41 = vld [vmem:[#allocation2 + $0x30] sm:$0xff] (!%p319_p12) }
  0x5b   : > { %v332_v30 = vld [vmem:[#allocation2 + $0x48] sm:$0xff]  ;;  %v337_v42 = vld [vmem:[#allocation2 + $0x70] sm:$0xff]  ;;  %v327_v43 = vld [vmem:[#allocation2 + $0x20] sm:$0xff] }
  0x5c   : > { %v335_v44 = vld [vmem:[#allocation2 + $0x60] sm:$0xff]  ;;  %v330_v47 = vld [vmem:[#allocation2 + $0x38] sm:$0xff]  ;;  %v328_v53 = vld [vmem:[#allocation2 + $0x28] sm:$0xff] }
  0x5d   : > { %1393 = vmatpush3.bf16.msra.mxu0 %v1515_v3  ;;  %1462 = vmatpush3.bf16.msra.mxu1 %v1515_v3  ;;  %v338_v48 = vld [vmem:[#allocation2 + $0x78] sm:$0xff]  ;;  %v336_v54 = vld [vmem:[#allocation2 + $0x68] sm:$0xff] }
  0x5e   : > { %1394 = vmatprep.subr.bf16.mxu0 %v1516_v4  ;;  %1455 = vmatprep.subr.bf16.mxu1 %v1516_v4 }
  0x61   : > { %1395 = vmatpush3.bf16.msra.mxu0 %v1516_v4  ;;  %1463 = vmatpush3.bf16.msra.mxu1 %v1516_v4 }
  0x62   : > { %1396 = vmatprep.subr.bf16.mxu0 %v1517_v7  ;;  %1456 = vmatprep.subr.bf16.mxu1 %v1517_v7 }
  0x65   : > { %1397 = vmatpush3.bf16.msra.mxu0 %v1517_v7  ;;  %1464 = vmatpush3.bf16.msra.mxu1 %v1517_v7 }
  0x66   : > { %1398 = vmatprep.subr.bf16.mxu0 %v1518_v8  ;;  %1457 = vmatprep.subr.bf16.mxu1 %v1518_v8 }
  0x69   : > { %1399 = vmatpush3.bf16.msra.mxu0 %v1518_v8  ;;  %1465 = vmatpush3.bf16.msra.mxu1 %v1518_v8 }
  0x6a   : > { %1400 = vmatprep.subr.bf16.mxu0 %v1519_v9  ;;  %1458 = vmatprep.subr.bf16.mxu1 %v1519_v9 }
  0x6d   : > { %1401 = vmatpush3.bf16.msra.mxu0 %v1519_v9  ;;  %1466 = vmatpush3.bf16.msra.mxu1 %v1519_v9 }
  0x6e   : > { %1402 = vmatprep.subr.bf16.mxu0 %v1520_v10  ;;  %1459 = vmatprep.subr.bf16.mxu1 %v1520_v10 }
  0x71   : > { %1403 = vmatpush3.bf16.msra.mxu0 %v1520_v10  ;;  %1467 = vmatpush3.bf16.msra.mxu1 %v1520_v10 }
  0x74   : > { %1405 = vmatmul.mubr.bf16.vlgmr.msra.gmra.mrb[0].mxu0 %v1523_v11  ;;  %1413 = vmatmul.mubr.bf16.vlgmr.msra.gmra.mrb[0].mxu1 %v1524_v12 }
  0x75   : > { %1408 = vmatprep.mubr.bf16.mxu0 %v1525_v13  ;;  %1416 = vmatprep.mubr.bf16.mxu1 %v1526_v14 }
  0x7c   : > { %1409 = vmatmul.mubr.bf16.gmra.mrb[4].mxu0 %v1527_v15  ;;  %1417 = vmatmul.mubr.bf16.gmra.mrb[4].mxu1 %v1528_v16 }
 0x147   : > { %v1406_v21 = vpop.f32.mrb[0].mxu0  ;;  %v1414_v22 = vpop.f32.mrb[0].mxu1 }
 0x148   : > { %v566_v25 = vadd.f32 %v1406_v21, %v325_v17  ;;  %v574_v26 = vadd.f32 %v1414_v22, %v333_v18  ;;  %v501_v27 = vpop.f32.mrb[1].mxu0  ;;  %v533_v28 = vpop.f32.mrb[1].mxu1 }
 0x149   : > { %v564_v31 = vadd.f32 %v501_v27, %v323_v19  ;;  %v572_v32 = vadd.f32 %v533_v28, %v331_v20  ;;  %v1407_v33 = vpop.f32.mrb[2].mxu0  ;;  %v1415_v34 = vpop.f32.mrb[2].mxu1 }
 0x14a   : > { %582 = vst [vmem:[#allocation2 + $0x10] sm:$0xff] %v566_v25  ;;  %590 = vst [vmem:[#allocation2 + $0x50] sm:$0xff] %v574_v26  ;;  %v567_v35 = vadd.f32 %v1407_v33, %v326_v23  ;;  %v575_v36 = vadd.f32 %v1415_v34, %v334_v24  ;;  %v504_v37 = vpop.f32.mrb[3].mxu0  ;;  %v536_v38 = vpop.f32.mrb[3].mxu1 }
 0x14b   : > { %580 = vst [vmem:[#allocation2] sm:$0xff] %v564_v31  ;;  %588 = vst [vmem:[#allocation2 + $0x40] sm:$0xff] %v572_v32  ;;  %v565_v39 = vadd.f32 %v504_v37, %v324_v29  ;;  %v573_v40 = vadd.f32 %v536_v38, %v332_v30 }
 0x14c   : > { %583 = vst [vmem:[#allocation2 + $0x18] sm:$0xff] %v567_v35  ;;  %591 = vst [vmem:[#allocation2 + $0x58] sm:$0xff] %v575_v36 }
 0x14d   : > { %581 = vst [vmem:[#allocation2 + $0x8] sm:$0xff] %v565_v39  ;;  %589 = vst [vmem:[#allocation2 + $0x48] sm:$0xff] %v573_v40 }
 0x14f   : > { %v1410_v45 = vpop.f32.mrb[4].mxu0  ;;  %v1418_v46 = vpop.f32.mrb[4].mxu1 }
 0x150   : > { %v570_v49 = vadd.f32 %v1410_v45, %v329_v41  ;;  %v578_v50 = vadd.f32 %v1418_v46, %v337_v42  ;;  %v517_v51 = vpop.f32.mrb[5].mxu0  ;;  %v549_v52 = vpop.f32.mrb[5].mxu1 }
 0x151   : > { %v568_v55 = vadd.f32 %v517_v51, %v327_v43  ;;  %v576_v56 = vadd.f32 %v549_v52, %v335_v44  ;;  %v1411_v57 = vpop.f32.mrb[6].mxu0  ;;  %v1419_v58 = vpop.f32.mrb[6].mxu1 }
 0x152   : > { %586 = vst [vmem:[#allocation2 + $0x30] sm:$0xff] %v570_v49  ;;  %594 = vst [vmem:[#allocation2 + $0x70] sm:$0xff] %v578_v50  ;;  %v571_v59 = vadd.f32 %v1411_v57, %v330_v47  ;;  %v579_v60 = vadd.f32 %v1419_v58, %v338_v48  ;;  %v520_v61 = vpop.f32.mrb[7].mxu0  ;;  %v552_v62 = vpop.f32.mrb[7].mxu1 }
 0x153   : > { %584 = vst [vmem:[#allocation2 + $0x20] sm:$0xff] %v568_v55  ;;  %592 = vst [vmem:[#allocation2 + $0x60] sm:$0xff] %v576_v56  ;;  %v569_v63 = vadd.f32 %v520_v61, %v328_v53  ;;  %v577_v0 = vadd.f32 %v552_v62, %v336_v54 }
 0x154   : > { %587 = vst [vmem:[#allocation2 + $0x38] sm:$0xff] %v571_v59  ;;  %595 = vst [vmem:[#allocation2 + $0x78] sm:$0xff] %v579_v60 }
 0x155   : > { %585 = vst [vmem:[#allocation2 + $0x28] sm:$0xff] %v569_v63  ;;  %593 = vst [vmem:[#allocation2 + $0x68] sm:$0xff] %v577_v0 }
 0x156 PF: > { %p597_p13 = pnand %p1737_p10, %p292_p7 }
 0x157   : > { %v1529_v1 = vld [vmem:[%s1699_s0] sm:$0xff] (!%p597_p13)   ;;  %v601_v2 = vlaneseq (!%p597_p13)  ;;  %v1530_v3 = vld [vmem:[%s1699_s0 + $0x8] sm:$0xff] (!%p597_p13)   ;;  %v1773_v4 = vstv (!%p597_p13), %s1720_s18  ;;  %v1778_v6 = vstv (!%p597_p13), %s1709_s10 }
 0x158   : > { %600 = sbr.rel (%p597_p13) target bundleno = 603 (0x25b), region = 40  ;;  %1420 = vmatprep.subr.bf16.mxu0 (!%p597_p13), %v1529_v1  ;;  %1468 = vmatprep.subr.bf16.mxu1 (!%p597_p13), %v1529_v1  ;;  %v1781_v7 = vstv (!%p597_p13), %s1717_s17  ;;  %v1531_v8 = vld [vmem:[%s1699_s0 + $0x10] sm:$0xff] (!%p597_p13)   ;;  %v1532_v16 = vld [vmem:[%s1699_s0 + $0x18] sm:$0xff] (!%p597_p13)   ;;  %v685_v18 = vld [vmem:[%s1704_s7] sm:$0xf] (!%p597_p13) }
 0x159   : > { %v1775_v5 = vshrl.u32 (!%p597_p13), %v601_v2, 7  ;;  %1421 = vmatpush3.bf16.msra.mxu0 (!%p597_p13), %v1529_v1  ;;  %1476 = vmatpush3.bf16.msra.mxu1 (!%p597_p13), %v1529_v1  ;;  %v686_v22 = vld [vmem:[%s1704_s7 + $0x4] sm:$0xf] (!%p597_p13)  ;;  %v693_v31 = vld [vmem:[%s1704_s7 + $0x20] sm:$0xf] (!%p597_p13)  ;;  %v1534_v40 = vld [vmem:[%s1699_s0 + $0x28] sm:$0xff] (!%p597_p13)  }
 0x15a   : > { %1422 = vmatprep.subr.bf16.mxu0 (!%p597_p13), %v1530_v3  ;;  %1469 = vmatprep.subr.bf16.mxu1 (!%p597_p13), %v1530_v3  ;;  %v1533_v28 = vld [vmem:[%s1699_s0 + $0x20] sm:$0xff] (!%p597_p13)   ;;  %v1535_v49 = vld [vmem:[%s1699_s0 + $0x30] sm:$0xff] (!%p597_p13)   ;;  %v687_v55 = vld [vmem:[%s1704_s7 + $0x8] sm:$0xf] (!%p597_p13) }
 0x15b   : > { %v603_v9 = vadd.s32 (!%p597_p13), 8, %v1775_v5  ;;  %v619_v10 = vadd.s32 (!%p597_p13), %v1773_v4, %v1775_v5  ;;  %v610_v11 = vadd.s32 (!%p597_p13), 64, %v1775_v5  ;;  %v611_v13 = vadd.s32 (!%p597_p13), 72, %v1775_v5  ;;  %v694_v35 = vld [vmem:[%s1704_s7 + $0x24] sm:$0xf] (!%p597_p13)  ;;  %v1536_v57 = vld [vmem:[%s1699_s0 + $0x38] sm:$0xff] (!%p597_p13)  }
 0x15c   : > { %v604_v15 = vadd.s32 (!%p597_p13), 16, %v1775_v5  ;;  %v605_v20 = vadd.s32 (!%p597_p13), 24, %v1775_v5  ;;  %v612_v24 = vadd.s32 (!%p597_p13), 80, %v1775_v5  ;;  %v613_v26 = vadd.s32 (!%p597_p13), 88, %v1775_v5  ;;  %v688_v58 = vld [vmem:[%s1704_s7 + $0xc] sm:$0xf] (!%p597_p13) }
 0x15d   : > { %v620_v12 = vadd.s32 (!%p597_p13), %v1773_v4, %v603_v9  ;;  %vm636_vm0 = vcmp.ge.s32.totalorder (!%p597_p13), %v619_v10, %v1778_v6  ;;  %vm653_vm1 = vcmp.lt.s32.totalorder (!%p597_p13), %v619_v10, %v1781_v7  ;;  %1423 = vmatpush3.bf16.msra.mxu0 (!%p597_p13), %v1530_v3  ;;  %1477 = vmatpush3.bf16.msra.mxu1 (!%p597_p13), %v1530_v3  ;;  %v606_v36 = vadd.s32 (!%p597_p13), 32, %v1775_v5  ;;  %v695_v59 = vld [vmem:[%s1704_s7 + $0x28] sm:$0xf] (!%p597_p13)  ;;  %v696_v60 = vld [vmem:[%s1704_s7 + $0x2c] sm:$0xf] (!%p597_p13)  ;;  %v772_v63 = vld [vmem:[#allocation2 + $0x38] sm:$0xff] (!%p597_p13) }
 0x15e   : > { %v627_v14 = vadd.s32 (!%p597_p13), %v1773_v4, %v610_v11  ;;  %1424 = vmatprep.subr.bf16.mxu0 (!%p597_p13), %v1531_v8  ;;  %1470 = vmatprep.subr.bf16.mxu1 (!%p597_p13), %v1531_v8  ;;  %vm1797_vm4 = vmand (!%p597_p13), %vm636_vm0, %vm653_vm1  ;;  %v628_v19 = vadd.s32 (!%p597_p13), %v1773_v4, %v611_v13  ;;  %v621_v23 = vadd.s32 (!%p597_p13), %v1773_v4, %v604_v15  ;;  %v607_v38 = vadd.s32 (!%p597_p13), 40, %v1775_v5  ;;  %v689_v0 = vld [vmem:[%s1704_s7 + $0x10] sm:$0xf] (!%p597_p13)  ;;  %v690_v1 = vld [vmem:[%s1704_s7 + $0x14] sm:$0xf] (!%p597_p13) }
 0x15f   : > { %vm637_vm2 = vcmp.ge.s32.totalorder %v620_v12, %v1778_v6  ;;  %vm654_vm3 = vcmp.lt.s32.totalorder %v620_v12, %v1781_v7  ;;  %vm733_vm8 = vmpackc.low %vm1797_vm4, %vm1797_vm4  ;;  %v622_v25 = vadd.s32 %v1773_v4, %v605_v20  ;;  %v629_v32 = vadd.s32 %v1773_v4, %v612_v24  ;;  %v697_v15 = vld [vmem:[%s1704_s7 + $0x30] sm:$0xf]  ;;  %v699_v30 = vld [vmem:[%s1704_s7 + $0x38] sm:$0xf] }
 0x160   : > { %vm1804_vm5 = vmand %vm637_vm2, %vm654_vm3  ;;  %vm644_vm6 = vcmp.ge.s32.totalorder %v627_v14, %v1778_v6  ;;  %vm661_vm7 = vcmp.lt.s32.totalorder %v627_v14, %v1781_v7  ;;  %vm645_vm9 = vcmp.ge.s32.totalorder %v628_v19, %v1778_v6  ;;  %vm662_vm10 = vcmp.lt.s32.totalorder %v628_v19, %v1781_v7 }
 0x161   : > { %1425 = vmatpush3.bf16.msra.mxu0 %v1531_v8  ;;  %1478 = vmatpush3.bf16.msra.mxu1 %v1531_v8  ;;  %vm734_vm11 = vmpackc.low %vm1804_vm5, %vm1804_vm5  ;;  %v749_v27 = vsel %vm733_vm8, %v685_v18, 0  ;;  %vm638_vm14 = vcmp.ge.s32.totalorder %v621_v23, %v1778_v6  ;;  %vm655_vm15 = vcmp.lt.s32.totalorder %v621_v23, %v1781_v7  ;;  %vm639_vm1 = vcmp.ge.s32.totalorder %v622_v25, %v1778_v6  ;;  %v698_v18 = vld [vmem:[%s1704_s7 + $0x34] sm:$0xf] }
 0x162   : > { %1426 = vmatprep.subr.bf16.mxu0 %v1532_v16  ;;  %1471 = vmatprep.subr.bf16.mxu1 %v1532_v16  ;;  %v750_v29 = vsel %vm734_vm11, %v686_v22, 0  ;;  %vm1828_vm12 = vmand %vm644_vm6, %vm661_vm7  ;;  %vm656_vm2 = vcmp.lt.s32.totalorder %v622_v25, %v1781_v7  ;;  %v630_v37 = vadd.s32 %v1773_v4, %v613_v26  ;;  %vm646_vm5 = vcmp.ge.s32.totalorder %v629_v32, %v1778_v6  ;;  %v691_v26 = vld [vmem:[%s1704_s7 + $0x18] sm:$0xf] }
 0x163   : > { %v1257_v33 = vcombine.low %v749_v27, %v750_v29  ;;  %vm1838_vm13 = vmand %vm645_vm9, %vm662_vm10  ;;  %v614_v43 = vadd.s32 96, %v1775_v5  ;;  %vm663_vm7 = vcmp.lt.s32.totalorder %v629_v32, %v1781_v7  ;;  %v623_v46 = vadd.s32 %v1773_v4, %v606_v36  ;;  %v775_v36 = vld [vmem:[#allocation2 + $0x50] sm:$0xff] }
 0x164   : > { %vm741_vm0 = vmpackc.low %vm1828_vm12, %vm1828_vm12  ;;  %v615_v47 = vadd.s32 104, %v1775_v5  ;;  %vm647_vm9 = vcmp.ge.s32.totalorder %v630_v37, %v1778_v6  ;;  %vm664_vm10 = vcmp.lt.s32.totalorder %v630_v37, %v1781_v7  ;;  %v624_v48 = vadd.s32 %v1773_v4, %v607_v38  ;;  %v773_v37 = vld [vmem:[#allocation2 + $0x40] sm:$0xff] }
 0x165   : > { %1427 = vmatpush3.bf16.msra.mxu0 %v1532_v16  ;;  %1479 = vmatpush3.bf16.msra.mxu1 %v1532_v16  ;;  %vm742_vm3 = vmpackc.low %vm1838_vm13, %vm1838_vm13  ;;  %v757_v39 = vsel %vm741_vm0, %v693_v31, 0  ;;  %v631_v51 = vadd.s32 %v1773_v4, %v614_v43  ;;  %v608_v54 = vadd.s32 48, %v1775_v5  ;;  %v609_v56 = vadd.s32 56, %v1775_v5  ;;  %v700_v31 = vld [vmem:[%s1704_s7 + $0x3c] sm:$0xf] }
 0x166   : > { %1428 = vmatprep.subr.bf16.mxu0 %v1533_v28  ;;  %1472 = vmatprep.subr.bf16.mxu1 %v1533_v28  ;;  %v758_v41 = vsel %vm742_vm3, %v694_v35, 0  ;;  %vm1861_vm4 = vmand %vm638_vm14, %vm655_vm15  ;;  %vm640_vm14 = vcmp.ge.s32.totalorder %v623_v46, %v1778_v6  ;;  %vm657_vm15 = vcmp.lt.s32.totalorder %v623_v46, %v1781_v7  ;;  %v632_v53 = vadd.s32 %v1773_v4, %v615_v47  ;;  %v766_v46 = vld [vmem:[#allocation2 + $0x8] sm:$0xff] }
 0x167   : > { %1436 = vmatprep.mubr.bf16.mxu0 %v1257_v33  ;;  %v1261_v44 = vcombine.low %v757_v39, %v758_v41  ;;  %vm1871_vm6 = vmand %vm639_vm1, %vm656_vm2  ;;  %vm641_vm1 = vcmp.ge.s32.totalorder %v624_v48, %v1778_v6  ;;  %vm658_vm2 = vcmp.lt.s32.totalorder %v624_v48, %v1781_v7  ;;  %v625_v2 = vadd.s32 %v1773_v4, %v608_v54  ;;  %v776_v41 = vld [vmem:[#allocation2 + $0x58] sm:$0xff]  ;;  %v774_v47 = vld [vmem:[#allocation2 + $0x48] sm:$0xff] }
 0x168   : > { %vm735_vm8 = vmpackc.low %vm1861_vm4, %vm1861_vm4  ;;  %v616_v3 = vadd.s32 112, %v1775_v5  ;;  %v626_v9 = vadd.s32 %v1773_v4, %v609_v56  ;;  %v617_v10 = vadd.s32 120, %v1775_v5 }
 0x169   : > { %1429 = vmatpush3.bf16.msra.mxu0 %v1533_v28  ;;  %1480 = vmatpush3.bf16.msra.mxu1 %v1533_v28  ;;  %vm736_vm11 = vmpackc.low %vm1871_vm6, %vm1871_vm6  ;;  %v751_v62 = vsel %vm735_vm8, %v687_v55, 0  ;;  %vm666_vm8 = vcmp.lt.s32.totalorder %v632_v53, %v1781_v7  ;;  %v692_v28 = vld [vmem:[%s1704_s7 + $0x1c] sm:$0xf] }
 0x16a   : > { %1430 = vmatprep.subr.bf16.mxu0 %v1534_v40  ;;  %1473 = vmatprep.subr.bf16.mxu1 %v1534_v40  ;;  %vm1890_vm12 = vmand %vm646_vm5, %vm663_vm7  ;;  %vm648_vm7 = vcmp.ge.s32.totalorder %v631_v51, %v1778_v6  ;;  %v752_v8 = vsel %vm736_vm11, %v688_v58, 0  ;;  %v633_v19 = vadd.s32 %v1773_v4, %v616_v3  ;;  %v634_v21 = vadd.s32 %v1773_v4, %v617_v10  ;;  %v771_v58 = vld [vmem:[#allocation2 + $0x30] sm:$0xff]  ;;  %v780_v3 = vld [vmem:[#allocation2 + $0x78] sm:$0xff] }
 0x16b   : > { %1444 = vmatprep.mubr.bf16.mxu1 %v1261_v44  ;;  %vm1895_vm13 = vmand %vm647_vm9, %vm664_vm10  ;;  %vm665_vm9 = vcmp.lt.s32.totalorder %v631_v51, %v1781_v7  ;;  %v1258_v16 = vcombine.low %v751_v62, %v752_v8  ;;  %v777_v62 = vld [vmem:[#allocation2 + $0x60] sm:$0xff]  ;;  %v770_v8 = vld [vmem:[#allocation2 + $0x28] sm:$0xff] }
 0x16c   : > { %vm743_vm0 = vmpackc.low %vm1890_vm12, %vm1890_vm12 }
 0x16d   : > { %1431 = vmatpush3.bf16.msra.mxu0 %v1534_v40  ;;  %1481 = vmatpush3.bf16.msra.mxu1 %v1534_v40  ;;  %vm744_vm3 = vmpackc.low %vm1895_vm13, %vm1895_vm13  ;;  %v759_v11 = vsel %vm743_vm0, %v695_v59, 0  ;;  %vm642_vm13 = vcmp.ge.s32.totalorder %v625_v2, %v1778_v6  ;;  %v768_v40 = vld [vmem:[#allocation2 + $0x18] sm:$0xff]  ;;  %v779_v59 = vld [vmem:[#allocation2 + $0x70] sm:$0xff] }
 0x16e   : > { %1432 = vmatprep.subr.bf16.mxu0 %v1535_v49  ;;  %1474 = vmatprep.subr.bf16.mxu1 %v1535_v49  ;;  %vm1921_vm5 = vmand %vm640_vm14, %vm657_vm15  ;;  %vm649_vm14 = vcmp.ge.s32.totalorder %v632_v53, %v1778_v6  ;;  %v760_v12 = vsel %vm744_vm3, %v696_v60, 0  ;;  %vm659_vm15 = vcmp.lt.s32.totalorder %v625_v2, %v1781_v7  ;;  %v769_v60 = vld [vmem:[#allocation2 + $0x20] sm:$0xff] }
 0x16f   : > { %vm1936_vm10 = vmand %vm641_vm1, %vm658_vm2  ;;  %v1262_v20 = vcombine.low %v759_v11, %v760_v12  ;;  %vm643_vm1 = vcmp.ge.s32.totalorder %v626_v9, %v1778_v6  ;;  %vm660_vm2 = vcmp.lt.s32.totalorder %v626_v9, %v1781_v7 }
 0x170   : > { %vm737_vm4 = vmpackc.low %vm1921_vm5, %vm1921_vm5 }
 0x171   : > { %1433 = vmatpush3.bf16.msra.mxu0 %v1535_v49  ;;  %1482 = vmatpush3.bf16.msra.mxu1 %v1535_v49  ;;  %vm738_vm6 = vmpackc.low %vm1936_vm10, %vm1936_vm10  ;;  %v753_v5 = vsel %vm737_vm4, %v689_v0, 0  ;;  %vm667_vm10 = vcmp.lt.s32.totalorder %v633_v19, %v1781_v7  ;;  %vm651_vm4 = vcmp.ge.s32.totalorder %v634_v21, %v1778_v6 }
 0x172   : > { %1434 = vmatprep.subr.bf16.mxu0 %v1536_v57  ;;  %1475 = vmatprep.subr.bf16.mxu1 %v1536_v57  ;;  %v754_v13 = vsel %vm738_vm6, %v690_v1, 0  ;;  %vm1973_vm11 = vmand %vm648_vm7, %vm665_vm9  ;;  %vm650_vm9 = vcmp.ge.s32.totalorder %v633_v19, %v1778_v6  ;;  %v767_v6 = vld [vmem:[#allocation2 + $0x10] sm:$0xff] }
 0x173   : > { %vm1982_vm12 = vmand %vm649_vm14, %vm666_vm8  ;;  %v1259_v22 = vcombine.low %v753_v5, %v754_v13  ;;  %vm668_vm8 = vcmp.lt.s32.totalorder %v634_v21, %v1781_v7  ;;  %v765_v7 = vld [vmem:[#allocation2] sm:$0xff]  ;;  %v778_v5 = vld [vmem:[#allocation2 + $0x68] sm:$0xff] }
 0x174   : > { %vm745_vm0 = vmpackc.low %vm1973_vm11, %vm1973_vm11 }
 0x175   : > { %1435 = vmatpush3.bf16.msra.mxu0 %v1536_v57  ;;  %1483 = vmatpush3.bf16.msra.mxu1 %v1536_v57  ;;  %vm746_vm3 = vmpackc.low %vm1982_vm12, %vm1982_vm12  ;;  %v761_v23 = vsel %vm745_vm0, %v697_v15, 0 }
 0x176   : > { %v762_v24 = vsel %vm746_vm3, %v698_v18, 0  ;;  %vm1999_vm5 = vmand %vm642_vm13, %vm659_vm15 }
 0x177   : > { %v1263_v27 = vcombine.low %v761_v23, %v762_v24  ;;  %vm676_vm7 = vmand %vm643_vm1, %vm660_vm2 }
 0x178   : > { %1437 = vmatmul.mubr.bf16.vlgmr.msra.gmra.mrb[0].mxu0 %v1258_v16  ;;  %1445 = vmatmul.mubr.bf16.vlgmr.msra.gmra.mrb[0].mxu1 %v1262_v20  ;;  %vm739_vm14 = vmpackc.low %vm1999_vm5, %vm1999_vm5 }
 0x179   : > { %1440 = vmatprep.mubr.bf16.mxu0 %v1259_v22  ;;  %1448 = vmatprep.mubr.bf16.mxu1 %v1263_v27  ;;  %vm740_vm6 = vmpackc.low %vm676_vm7, %vm676_vm7  ;;  %v755_v4 = vsel %vm739_vm14, %v691_v26, 0 }
 0x17a   : > { %v756_v29 = vsel %vm740_vm6, %v692_v28, 0  ;;  %vm683_vm11 = vmand %vm650_vm9, %vm667_vm10 }
 0x17b   : > { %vm684_vm12 = vmand %vm651_vm4, %vm668_vm8  ;;  %v1260_v32 = vcombine.low %v755_v4, %v756_v29 }
 0x17c   : > { %vm747_vm13 = vmpackc.low %vm683_vm11, %vm683_vm11 }
 0x17d   : > { %vm748_vm15 = vmpackc.low %vm684_vm12, %vm684_vm12  ;;  %v763_v33 = vsel %vm747_vm13, %v699_v30, 0 }
 0x17e   : > { %v764_v34 = vsel %vm748_vm15, %v700_v31, 0 }
 0x17f   : > { %v1264_v35 = vcombine.low %v763_v33, %v764_v34 }
 0x180   : > { %1441 = vmatmul.mubr.bf16.gmra.mrb[4].mxu0 %v1260_v32 }
 0x181   : > { %1449 = vmatmul.mubr.bf16.gmra.mrb[4].mxu1 %v1264_v35 }
 0x24b   : > { %v1438_v38 = vpop.f32.mrb[0].mxu0  ;;  %v1446_v39 = vpop.f32.mrb[0].mxu1 }
 0x24c   : > { %v992_v42 = vadd.f32 %v1438_v38, %v767_v6  ;;  %v1000_v43 = vadd.f32 %v1446_v39, %v775_v36  ;;  %v927_v44 = vpop.f32.mrb[1].mxu0  ;;  %v959_v45 = vpop.f32.mrb[1].mxu1 }
 0x24d   : > { %v990_v48 = vadd.f32 %v927_v44, %v765_v7  ;;  %v998_v49 = vadd.f32 %v959_v45, %v773_v37  ;;  %v1439_v50 = vpop.f32.mrb[2].mxu0  ;;  %v1447_v51 = vpop.f32.mrb[2].mxu1 }
 0x24e   : > { %1008 = vst [vmem:[#allocation2 + $0x10] sm:$0xff] %v992_v42  ;;  %1016 = vst [vmem:[#allocation2 + $0x50] sm:$0xff] %v1000_v43  ;;  %v993_v52 = vadd.f32 %v1439_v50, %v768_v40  ;;  %v1001_v53 = vadd.f32 %v1447_v51, %v776_v41  ;;  %v930_v54 = vpop.f32.mrb[3].mxu0  ;;  %v962_v55 = vpop.f32.mrb[3].mxu1 }
 0x24f   : > { %1006 = vst [vmem:[#allocation2] sm:$0xff] %v990_v48  ;;  %1014 = vst [vmem:[#allocation2 + $0x40] sm:$0xff] %v998_v49  ;;  %v991_v56 = vadd.f32 %v930_v54, %v766_v46  ;;  %v999_v57 = vadd.f32 %v962_v55, %v774_v47 }
 0x250   : > { %1009 = vst [vmem:[#allocation2 + $0x18] sm:$0xff] %v993_v52  ;;  %1017 = vst [vmem:[#allocation2 + $0x58] sm:$0xff] %v1001_v53 }
 0x251   : > { %1007 = vst [vmem:[#allocation2 + $0x8] sm:$0xff] %v991_v56  ;;  %1015 = vst [vmem:[#allocation2 + $0x48] sm:$0xff] %v999_v57 }
 0x253   : > { %v1442_v61 = vpop.f32.mrb[4].mxu0 }
 0x254   : > { %v996_v0 = vadd.f32 %v1442_v61, %v771_v58  ;;  %v1450_v1 = vpop.f32.mrb[4].mxu1  ;;  %v943_v2 = vpop.f32.mrb[5].mxu0 }
 0x255   : > { %v1004_v9 = vadd.f32 %v1450_v1, %v779_v59  ;;  %v994_v10 = vadd.f32 %v943_v2, %v769_v60  ;;  %v975_v11 = vpop.f32.mrb[5].mxu1  ;;  %v1443_v12 = vpop.f32.mrb[6].mxu0 }
 0x256   : > { %1012 = vst [vmem:[#allocation2 + $0x30] sm:$0xff] %v996_v0  ;;  %v1002_v13 = vadd.f32 %v975_v11, %v777_v62  ;;  %v997_v14 = vadd.f32 %v1443_v12, %v772_v63  ;;  %v1451_v15 = vpop.f32.mrb[6].mxu1  ;;  %v946_v16 = vpop.f32.mrb[7].mxu0 }
 0x257   : > { %1020 = vst [vmem:[#allocation2 + $0x70] sm:$0xff] %v1004_v9  ;;  %1010 = vst [vmem:[#allocation2 + $0x20] sm:$0xff] %v994_v10  ;;  %v1005_v17 = vadd.f32 %v1451_v15, %v780_v3  ;;  %v995_v18 = vadd.f32 %v946_v16, %v770_v8  ;;  %v978_v19 = vpop.f32.mrb[7].mxu1 }
 0x258   : > { %1018 = vst [vmem:[#allocation2 + $0x60] sm:$0xff] %v1002_v13  ;;  %1013 = vst [vmem:[#allocation2 + $0x38] sm:$0xff] %v997_v14  ;;  %v1003_v20 = vadd.f32 %v978_v19, %v778_v5 }
 0x259   : > { %1021 = vst [vmem:[#allocation2 + $0x78] sm:$0xff] %v1005_v17  ;;  %1011 = vst [vmem:[#allocation2 + $0x28] sm:$0xff] %v995_v18 }
 0x25a   : > { %1019 = vst [vmem:[#allocation2 + $0x68] sm:$0xff] %v1003_v20 }
 0x25b PF: > { %1025 = sbr.rel (!%p1733_p9) target bundleno = 613 (0x265), region = 44  ;;  %v1026_v21 = vld [vmem:[#allocation2] sm:$0xff] (%p1733_p9)  ;;  %v1027_v22 = vld [vmem:[#allocation2 + $0x8] sm:$0xff] (%p1733_p9)  ;;  %v1028_v23 = vld [vmem:[#allocation2 + $0x10] sm:$0xff] (%p1733_p9) }
 0x25c   : > { %v1312_v24 = vpack.c.bf16 (%p1733_p9), %v1027_v22, %v1026_v21  ;;  %v1029_v25 = vld [vmem:[#allocation2 + $0x18] sm:$0xff] (%p1733_p9)  ;;  %v1034_v31 = vld [vmem:[#allocation2 + $0x40] sm:$0xff] (%p1733_p9)  ;;  %v1035_v33 = vld [vmem:[#allocation2 + $0x48] sm:$0xff] (%p1733_p9) }
 0x25d   : > { %v1317_v28 = vpack.c.bf16 (%p1733_p9), %v1029_v25, %v1028_v23  ;;  %v1032_v29 = vld [vmem:[#allocation2 + $0x30] sm:$0xff] (%p1733_p9)  ;;  %v1037_v35 = vld [vmem:[#allocation2 + $0x58] sm:$0xff] (%p1733_p9)  ;;  %v1332_v6 = vpack.c.bf16 (%p1733_p9), %v1035_v33, %v1034_v31 }
 0x25e   : > { %v1030_v26 = vld [vmem:[#allocation2 + $0x20] sm:$0xff] (%p1733_p9)  ;;  %1313 = vst [vmem:[%s1714_s13] sm:$0xff] (%p1733_p9), %v1312_v24   ;;  %v1036_v34 = vld [vmem:[#allocation2 + $0x50] sm:$0xff] (%p1733_p9) }
 0x25f   : > { %v1033_v30 = vld [vmem:[#allocation2 + $0x38] sm:$0xff] (%p1733_p9)  ;;  %1349 = vst [vmem:[%s1714_s13 + $0x8] sm:$0xff] (%p1733_p9), %v1317_v28   ;;  %v1337_v36 = vpack.c.bf16 (%p1733_p9), %v1037_v35, %v1036_v34  ;;  %v1038_v7 = vld [vmem:[#allocation2 + $0x60] sm:$0xff] (%p1733_p9)  ;;  %v1040_v38 = vld [vmem:[#allocation2 + $0x70] sm:$0xff] (%p1733_p9) }
 0x260   : > { %v1031_v27 = vld [vmem:[#allocation2 + $0x28] sm:$0xff] (%p1733_p9)  ;;  %v1327_v32 = vpack.c.bf16 (%p1733_p9), %v1033_v30, %v1032_v29  ;;  %v1041_v40 = vld [vmem:[#allocation2 + $0x78] sm:$0xff] (%p1733_p9)  ;;  %1352 = vst [vmem:[%s1714_s13 + $0x20] sm:$0xff] (%p1733_p9), %v1332_v6  }
 0x261   : > { %v1322_v4 = vpack.c.bf16 (%p1733_p9), %v1031_v27, %v1030_v26  ;;  %v1039_v37 = vld [vmem:[#allocation2 + $0x68] sm:$0xff] (%p1733_p9)  ;;  %1353 = vst [vmem:[%s1714_s13 + $0x28] sm:$0xff] (%p1733_p9), %v1337_v36   ;;  %v1347_v41 = vpack.c.bf16 (%p1733_p9), %v1041_v40, %v1040_v38 }
 0x262   : > { %1351 = vst [vmem:[%s1714_s13 + $0x18] sm:$0xff] %v1327_v32   ;;  %v1342_v39 = vpack.c.bf16 %v1039_v37, %v1038_v7 }
 0x263   : > { %1350 = vst [vmem:[%s1714_s13 + $0x10] sm:$0xff] %v1322_v4   ;;  %1355 = vst [vmem:[%s1714_s13 + $0x38] sm:$0xff] %v1347_v41  }
 0x264   : > { %1354 = vst [vmem:[%s1714_s13 + $0x30] sm:$0xff] %v1342_v39  }
 0x265 PF: > { %s34_s15 = sadd.s32 1, %s1609_s15   ;;  %s2069_s3 = smov %s1605_s14 }
 0x266   : > { %p31_p0 = scmp.ge.s32.totalorder %s34_s15, 6   ;;  %s2070_s14 = smov %s2072_s16 }
 0x268   :  { %33 = sbr.rel (!%p31_p0) target bundleno = 48 (0x30), region = 77 }

</bundles_post_ra>
